<compile_context>
chip_gen: v6e
topology: v6e:2x2x1
jax: 0.10.0
libtpu: 0.0.40
codegen_flags: <defaults>
</compile_context>

<pallas_src>
import functools

import jax
import jax.numpy as jnp
from jax import lax
from jax.experimental import pallas as pl
from jax.experimental.pallas import tpu as pltpu

# bf16 matmul operands (f32 accumulate) for the v6e/v7x MXU; elementwise
# BN/ReLU math stays f32 (v5e VPU has no bf16 path).  Set to jnp.float32 for
# bit-tighter numerics.
MATMUL_DTYPE = jnp.bfloat16


# --------------------------- Fused DenseLayer kernel -------------------------
def _dense_layer_kernel(x_ref, s1_ref, b1_ref, w1t_ref, s2_ref, b2_ref,
                        w2a_ref, o_ref, *, H, W, growth, matmul_dtype):
    # x_ref  : (1, Cin, M)   layer input channels, M = H*W (lane dim, dense)
    # s1/b1  : (Cin, 1)      folded BN1 scale/shift
    # w1t    : (Cmid, Cin)   1x1 conv weight, transposed
    # s2/b2  : (Cmid, 1)     folded BN2 scale/shift
    # w2a    : (9*Cg, Cmid)  3x3 conv weights, tap-major: rows [k*Cg,(k+1)*Cg)
    #                        hold w2[dy, dx].T with k = dy*3 + dx
    # o_ref  : (1, Cg, M)    this layer's growth-channel slice of the buffer
    M = H * W
    cg = growth

    # ---- BN1 + ReLU + 1x1 conv + BN2 + ReLU, all in (C, M) orientation ----
    x = x_ref[0]                                           # (Cin, M) f32
    a = jnp.maximum(x * s1_ref[...] + b1_ref[...], 0.0)    # f32 elementwise
    t = jnp.dot(w1t_ref[...].astype(matmul_dtype), a.astype(matmul_dtype),
                preferred_element_type=jnp.float32)        # (Cmid, M)
    m = jnp.maximum(t * s2_ref[...] + b2_ref[...], 0.0)    # (Cmid, M) f32

    # ---- 3x3 conv (pad=1): one matmul for all 9 taps, then shift + mask ----
    p = jnp.dot(w2a_ref[...].astype(matmul_dtype), m.astype(matmul_dtype),
                preferred_element_type=jnp.float32)        # (9*Cg, M)

    col = lax.broadcasted_iota(jnp.int32, (1, M), 1)
    xpos = col % W
    mask_l = xpos >= 1           # left  neighbour exists (x - 1 >= 0)
    mask_r = xpos <= W - 2       # right neighbour exists (x + 1 <  W)

    def shift_lanes(v, s):
        # u[:, i] = v[:, i + s], zero-filled outside [0, M).
        if s == 0:
            return v
        if s > 0:
            return jnp.concatenate(
                [v[:, s:], jnp.zeros((cg, s), v.dtype)], axis=1)
        return jnp.concatenate(
            [jnp.zeros((cg, -s), v.dtype), v[:, :s]], axis=1)

    acc = jnp.zeros((cg, M), jnp.float32)
    k = 0
    for oy in (-1, 0, 1):
        for ox in (-1, 0, 1):
            # out[:, y*W + x] += w2[oy+1, ox+1].T @ m[:, (y+oy)*W + (x+ox)]
            tap = shift_lanes(p[k * cg:(k + 1) * cg, :], oy * W + ox)
            if ox == -1:
                tap = jnp.where(mask_l, tap, 0.0)
            elif ox == 1:
                tap = jnp.where(mask_r, tap, 0.0)
            acc = acc + tap
            k += 1

    o_ref[...] = acc.reshape(1, cg, M)


def _dense_layer_call(feat, p, cin, growth, H, W):
    # feat: (N, C_total, M) accumulated feature buffer (aliased in/out).
    N, c_total, M = feat.shape
    cmid = p["w1t"].shape[0]
    chan_block = cin // growth     # output channel-slice position (in blocks)

    kernel = functools.partial(_dense_layer_kernel, H=H, W=W, growth=growth,
                               matmul_dtype=MATMUL_DTYPE)
    # Per-step VMEM footprint (double-buffered blocks) is only a few 100 KiB
    # at these shapes, far below the v7x 32 MiB scoped default.
    # TODO(synk): for large H*W, add a row-band grid axis (with a 1-row halo).
    return pl.pallas_call(
        kernel,
        out_shape=jax.ShapeDtypeStruct((N, c_total, M), jnp.float32),
        grid_spec=pltpu.PrefetchScalarGridSpec(
            num_scalar_prefetch=0,
            grid=(N,),
            in_specs=[
                # Read only the first `cin` channels of the feature buffer.
                pl.BlockSpec((1, cin, M), lambda n: (n, 0, 0)),
                pl.BlockSpec((cin, 1), lambda n: (0, 0)),
                pl.BlockSpec((cin, 1), lambda n: (0, 0)),
                pl.BlockSpec((cmid, cin), lambda n: (0, 0)),
                pl.BlockSpec((cmid, 1), lambda n: (0, 0)),
                pl.BlockSpec((cmid, 1), lambda n: (0, 0)),
                pl.BlockSpec((9 * growth, cmid), lambda n: (0, 0)),
            ],
            # Write only this layer's growth-channel slice, in place.
            out_specs=pl.BlockSpec((1, growth, M),
                                   lambda n: (n, chan_block, 0)),
        ),
        # The feature buffer is aliased: untouched channels keep their values,
        # which removes the per-layer concatenate copy entirely.
        input_output_aliases={0: 0},
        compiler_params=pltpu.CompilerParams(
            dimension_semantics=("parallel",)),
    )(feat, p["s1"], p["b1"], p["w1t"], p["s2"], p["b2"], p["w2a"])


# ------------------------- Parameter construction ---------------------------
def make_layer_params(key, in_channels, growth_rate, bn_size=4, eps=1e-5):
    cmid = bn_size * growth_rate
    ks = jax.random.split(key, 10)
    # BN1 (over in_channels)
    g1 = jax.random.uniform(ks[0], (in_channels,), jnp.float32, 0.5, 1.5)
    be1 = 0.1 * jax.random.normal(ks[1], (in_channels,), jnp.float32)
    m1 = 0.1 * jax.random.normal(ks[2], (in_channels,), jnp.float32)
    v1 = jax.random.uniform(ks[3], (in_channels,), jnp.float32, 0.5, 1.5)
    # conv1: 1x1 (in_channels -> cmid), no bias.
    w1 = 0.1 * jax.random.normal(ks[4], (in_channels, cmid), jnp.float32)
    # BN2 (over cmid)
    g2 = jax.random.uniform(ks[5], (cmid,), jnp.float32, 0.5, 1.5)
    be2 = 0.1 * jax.random.normal(ks[6], (cmid,), jnp.float32)
    m2 = 0.1 * jax.random.normal(ks[7], (cmid,), jnp.float32)
    v2 = jax.random.uniform(ks[8], (cmid,), jnp.float32, 0.5, 1.5)
    # conv2: 3x3 pad 1 (cmid -> growth_rate), HWIO layout.
    w2 = 0.1 * jax.random.normal(ks[9], (3, 3, cmid, growth_rate), jnp.float32)

    # Fold BN (eval mode) into per-channel scale/shift.
    s1 = g1 / jnp.sqrt(v1 + eps)
    sh1 = be1 - m1 * s1
    s2 = g2 / jnp.sqrt(v2 + eps)
    sh2 = be2 - m2 * s2
    return dict(
        s1=s1.reshape(-1, 1), b1=sh1.reshape(-1, 1),
        w1t=w1.T,                                             # (cmid, cin)
        s2=s2.reshape(-1, 1), b2=sh2.reshape(-1, 1),
        w2a=jnp.transpose(w2, (0, 1, 3, 2)).reshape(9 * growth_rate, cmid),
    )


# ----------------------------- DenseBlock ----------------------------------
@jax.jit
def dense_block_forward(x_nchw, params_list):
    N, c_in, H, W = x_nchw.shape
    growth = params_list[0]["w2a"].shape[0] // 9
    c_total = c_in + len(params_list) * growth
    M = H * W
    # Constraints of the in-place channel-slice writes (satisfied by real
    # DenseNet-121 channel counts: in_channels / growth are multiples of 8/32).
    # TODO(synk): general (non-multiple) channel counts need a padded buffer.
    assert growth % 8 == 0 and c_in % growth == 0, (c_in, growth)

    # Pre-allocate the final feature buffer once; layer outputs are written
    # into their channel slices in place (no per-layer concatenate).
    feat = jnp.pad(x_nchw.reshape(N, c_in, M),
                   ((0, 0), (0, c_total - c_in), (0, 0)))
    cin = c_in
    for p in params_list:
        feat = _dense_layer_call(feat, p, cin, growth, H, W)
        cin += growth
    # Same NCHW convention as the PyTorch module's output.
    return feat.reshape(N, c_total, H, W)


# -------------------------- Pure-JAX reference ------------------------------
def dense_block_reference(x_nchw, params_list):
    x = jnp.transpose(x_nchw, (0, 2, 3, 1))        # NHWC
    for p in params_list:
        s1, b1 = p["s1"][:, 0], p["b1"][:, 0]
        s2, b2 = p["s2"][:, 0], p["b2"][:, 0]
        w1 = p["w1t"].T                            # (cin, cmid)
        cg = p["w2a"].shape[0] // 9
        cmid = p["w2a"].shape[1]
        w2 = p["w2a"].reshape(3, 3, cg, cmid).transpose(0, 1, 3, 2)  # HWIO
        a = jnp.maximum(x * s1 + b1, 0.0)
        t = jnp.einsum("nhwc,cm->nhwm", a, w1)
        a2 = jnp.maximum(t * s2 + b2, 0.0)
        out = lax.conv_general_dilated(
            a2, w2, window_strides=(1, 1), padding="SAME",
            dimension_numbers=("NHWC", "HWIO", "NHWC"))
        x = jnp.concatenate([x, out], axis=-1)
    return jnp.transpose(x, (0, 3, 1, 2))


if __name__ == "__main__":
    # Small DenseBlock: in_channels=8, num_layers=2, growth_rate=8, bn_size=4.
    N, C_IN, H, W = 2, 8, 16, 16
    NUM_LAYERS, GROWTH, BN_SIZE = 2, 8, 4

    key = jax.random.PRNGKey(0)
    kx, kp = jax.random.split(key)
    x = jax.random.normal(kx, (N, C_IN, H, W), jnp.float32)  # NCHW (PyTorch)

    params_list = []
    c = C_IN
    pkeys = jax.random.split(kp, NUM_LAYERS)
    for i in range(NUM_LAYERS):
        params_list.append(make_layer_params(pkeys[i], c, GROWTH, BN_SIZE))
        c += GROWTH

    out = dense_block_forward(x, params_list)
    out = jax.block_until_ready(out)

    ref = dense_block_reference(x, params_list)
    assert out.shape == (N, C_IN + NUM_LAYERS * GROWTH, H, W), out.shape
    tol = 2e-2 if MATMUL_DTYPE == jnp.bfloat16 else 2e-4
    assert jnp.allclose(out, ref, rtol=tol, atol=tol), float(
        jnp.max(jnp.abs(out - ref)))

    print("KERNEL_OK")
</pallas_src>

<mosaic_0001>
module attributes {stable_mosaic.version = 11 : i64} {
  func.func @_dense_layer_kernel(%arg0: i32, %arg1: memref<1x16x256xf32, #tpu.memory_space<vmem>>, %arg2: memref<16x1xf32, #tpu.memory_space<vmem>>, %arg3: memref<16x1xf32, #tpu.memory_space<vmem>>, %arg4: memref<32x16xf32, #tpu.memory_space<vmem>>, %arg5: memref<32x1xf32, #tpu.memory_space<vmem>>, %arg6: memref<32x1xf32, #tpu.memory_space<vmem>>, %arg7: memref<72x32xf32, #tpu.memory_space<vmem>>, %arg8: memref<1x8x256xf32, #tpu.memory_space<vmem>>) attributes {dimension_semantics = [#tpu.dimension_semantics<parallel>], iteration_bounds = array<i64: 2>, scalar_prefetch = 0 : i64, scratch_operands = 0 : i64, tpu.core_type = #tpu.core_type<tc>, window_params = [{transform_indices = @transform_0, window_bounds = array<i64: 1, 16, 256>}, {pipeline_mode = #tpu.pipeline_mode<synchronous>, transform_indices = @transform_1, window_bounds = array<i64: 16, 1>}, {pipeline_mode = #tpu.pipeline_mode<synchronous>, transform_indices = @transform_2, window_bounds = array<i64: 16, 1>}, {pipeline_mode = #tpu.pipeline_mode<synchronous>, transform_indices = @transform_3, window_bounds = array<i64: 32, 16>}, {pipeline_mode = #tpu.pipeline_mode<synchronous>, transform_indices = @transform_4, window_bounds = array<i64: 32, 1>}, {pipeline_mode = #tpu.pipeline_mode<synchronous>, transform_indices = @transform_5, window_bounds = array<i64: 32, 1>}, {pipeline_mode = #tpu.pipeline_mode<synchronous>, transform_indices = @transform_6, window_bounds = array<i64: 72, 32>}, {transform_indices = @transform_7, window_bounds = array<i64: 1, 8, 256>}]} {
    %c0 = arith.constant 0 : index
    %c0_0 = arith.constant 0 : index
    %c0_1 = arith.constant 0 : index
    %0 = vector.load %arg1[%c0, %c0_0, %c0_1] : memref<1x16x256xf32, #tpu.memory_space<vmem>>, vector<1x16x256xf32>
    %1 = vector.shape_cast %0 : vector<1x16x256xf32> to vector<16x256xf32>
    %c0_2 = arith.constant 0 : index
    %c0_3 = arith.constant 0 : index
    %2 = vector.load %arg2[%c0_2, %c0_3] : memref<16x1xf32, #tpu.memory_space<vmem>>, vector<16x1xf32>
    %3 = vector.broadcast %2 : vector<16x1xf32> to vector<16x256xf32>
    %4 = arith.mulf %1, %3 : vector<16x256xf32>
    %c0_4 = arith.constant 0 : index
    %c0_5 = arith.constant 0 : index
    %5 = vector.load %arg3[%c0_4, %c0_5] : memref<16x1xf32, #tpu.memory_space<vmem>>, vector<16x1xf32>
    %6 = vector.broadcast %5 : vector<16x1xf32> to vector<16x256xf32>
    %7 = arith.addf %4, %6 : vector<16x256xf32>
    %cst = arith.constant 0.000000e+00 : f32
    %8 = vector.broadcast %cst : f32 to vector<16x256xf32>
    %9 = arith.maximumf %7, %8 : vector<16x256xf32>
    %c0_6 = arith.constant 0 : index
    %c0_7 = arith.constant 0 : index
    %10 = vector.load %arg4[%c0_6, %c0_7] : memref<32x16xf32, #tpu.memory_space<vmem>>, vector<32x16xf32>
    %11 = arith.truncf %10 : vector<32x16xf32> to vector<32x16xbf16>
    %12 = arith.truncf %9 : vector<16x256xf32> to vector<16x256xbf16>
    %cst_8 = arith.constant dense<0.000000e+00> : vector<32x256xf32>
    %13 = tpu.matmul %11, %12, %cst_8 {dimension_numbers = #tpu.dot_dimension_numbers<[1], [0], [0], [1], [0, 0, 1, 1], [], []>} : vector<32x16xbf16>, vector<16x256xbf16>, vector<32x256xf32> -> vector<32x256xf32>
    %c0_9 = arith.constant 0 : index
    %c0_10 = arith.constant 0 : index
    %14 = vector.load %arg5[%c0_9, %c0_10] : memref<32x1xf32, #tpu.memory_space<vmem>>, vector<32x1xf32>
    %15 = vector.broadcast %14 : vector<32x1xf32> to vector<32x256xf32>
    %16 = arith.mulf %13, %15 : vector<32x256xf32>
    %c0_11 = arith.constant 0 : index
    %c0_12 = arith.constant 0 : index
    %17 = vector.load %arg6[%c0_11, %c0_12] : memref<32x1xf32, #tpu.memory_space<vmem>>, vector<32x1xf32>
    %18 = vector.broadcast %17 : vector<32x1xf32> to vector<32x256xf32>
    %19 = arith.addf %16, %18 : vector<32x256xf32>
    %cst_13 = arith.constant 0.000000e+00 : f32
    %20 = vector.broadcast %cst_13 : f32 to vector<32x256xf32>
    %21 = arith.maximumf %19, %20 : vector<32x256xf32>
    %c0_14 = arith.constant 0 : index
    %c0_15 = arith.constant 0 : index
    %22 = vector.load %arg7[%c0_14, %c0_15] : memref<72x32xf32, #tpu.memory_space<vmem>>, vector<72x32xf32>
    %23 = arith.truncf %22 : vector<72x32xf32> to vector<72x32xbf16>
    %24 = arith.truncf %21 : vector<32x256xf32> to vector<32x256xbf16>
    %cst_16 = arith.constant dense<0.000000e+00> : vector<72x256xf32>
    %25 = tpu.matmul %23, %24, %cst_16 {dimension_numbers = #tpu.dot_dimension_numbers<[1], [0], [0], [1], [0, 0, 1, 1], [], []>} : vector<72x32xbf16>, vector<32x256xbf16>, vector<72x256xf32> -> vector<72x256xf32>
    %26 = tpu.iota {dimensions = array<i32: 1>} : vector<1x256xi32>
    %c16_i32 = arith.constant 16 : i32
    %c0_i32 = arith.constant 0 : i32
    %27 = arith.cmpi eq, %c16_i32, %c0_i32 : i32
    %c1_i32 = arith.constant 1 : i32
    %28 = arith.select %27, %c1_i32, %c16_i32 : i32
    %29 = vector.broadcast %28 : i32 to vector<1x256xi32>
    %30 = arith.remsi %26, %29 : vector<1x256xi32>
    %c0_i32_17 = arith.constant 0 : i32
    %31 = vector.broadcast %c0_i32_17 : i32 to vector<1x256xi32>
    %32 = arith.cmpi ne, %30, %31 : vector<1x256xi32>
    %c0_i32_18 = arith.constant 0 : i32
    %33 = vector.broadcast %c0_i32_18 : i32 to vector<1x256xi32>
    %34 = arith.cmpi slt, %30, %33 : vector<1x256xi32>
    %c0_i32_19 = arith.constant 0 : i32
    %35 = arith.cmpi slt, %28, %c0_i32_19 : i32
    %36 = vector.broadcast %35 : i1 to vector<1x256xi1>
    %37 = vector.broadcast %36 : vector<1x256xi1> to vector<1x256xi1>
    %38 = arith.xori %34, %37 : vector<1x256xi1>
    %39 = arith.andi %38, %32 : vector<1x256xi1>
    %40 = vector.broadcast %28 : i32 to vector<1x256xi32>
    %41 = arith.addi %30, %40 : vector<1x256xi32>
    %42 = arith.select %39, %41, %30 : vector<1x256xi1>, vector<1x256xi32>
    %c1_i32_20 = arith.constant 1 : i32
    %43 = vector.broadcast %c1_i32_20 : i32 to vector<1x256xi32>
    %44 = arith.cmpi sge, %42, %43 : vector<1x256xi32>
    %c14_i32 = arith.constant 14 : i32
    %45 = vector.broadcast %c14_i32 : i32 to vector<1x256xi32>
    %46 = arith.cmpi sle, %42, %45 : vector<1x256xi32>
    %cst_21 = arith.constant 0.000000e+00 : f32
    %47 = vector.broadcast %cst_21 : f32 to vector<8x256xf32>
    %48 = vector.extract_strided_slice %25 {offsets = [0, 0], sizes = [8, 256], strides = [1, 1]} : vector<72x256xf32> to vector<8x256xf32>
    %cst_22 = arith.constant 0.000000e+00 : f32
    %49 = vector.broadcast %cst_22 : f32 to vector<8x17xf32>
    %50 = vector.extract_strided_slice %48 {offsets = [0, 0], sizes = [8, 239], strides = [1, 1]} : vector<8x256xf32> to vector<8x239xf32>
    %51 = tpu.concatenate %49, %50 in 1 : vector<8x17xf32>, vector<8x239xf32> -> vector<8x256xf32>
    %cst_23 = arith.constant 0.000000e+00 : f32
    %52 = vector.shape_cast %44 : vector<1x256xi1> to vector<1x256xi1>
    %53 = vector.broadcast %52 : vector<1x256xi1> to vector<8x256xi1>
    %54 = vector.broadcast %cst_23 : f32 to vector<8x256xf32>
    %55 = arith.select %53, %51, %54 : vector<8x256xi1>, vector<8x256xf32>
    %56 = arith.addf %47, %55 : vector<8x256xf32>
    %57 = vector.extract_strided_slice %25 {offsets = [8, 0], sizes = [8, 256], strides = [1, 1]} : vector<72x256xf32> to vector<8x256xf32>
    %cst_24 = arith.constant 0.000000e+00 : f32
    %58 = vector.broadcast %cst_24 : f32 to vector<8x16xf32>
    %59 = vector.extract_strided_slice %57 {offsets = [0, 0], sizes = [8, 240], strides = [1, 1]} : vector<8x256xf32> to vector<8x240xf32>
    %60 = tpu.concatenate %58, %59 in 1 : vector<8x16xf32>, vector<8x240xf32> -> vector<8x256xf32>
    %61 = arith.addf %56, %60 : vector<8x256xf32>
    %62 = vector.extract_strided_slice %25 {offsets = [16, 0], sizes = [8, 256], strides = [1, 1]} : vector<72x256xf32> to vector<8x256xf32>
    %cst_25 = arith.constant 0.000000e+00 : f32
    %63 = vector.broadcast %cst_25 : f32 to vector<8x15xf32>
    %64 = vector.extract_strided_slice %62 {offsets = [0, 0], sizes = [8, 241], strides = [1, 1]} : vector<8x256xf32> to vector<8x241xf32>
    %65 = tpu.concatenate %63, %64 in 1 : vector<8x15xf32>, vector<8x241xf32> -> vector<8x256xf32>
    %cst_26 = arith.constant 0.000000e+00 : f32
    %66 = vector.shape_cast %46 : vector<1x256xi1> to vector<1x256xi1>
    %67 = vector.broadcast %66 : vector<1x256xi1> to vector<8x256xi1>
    %68 = vector.broadcast %cst_26 : f32 to vector<8x256xf32>
    %69 = arith.select %67, %65, %68 : vector<8x256xi1>, vector<8x256xf32>
    %70 = arith.addf %61, %69 : vector<8x256xf32>
    %71 = vector.extract_strided_slice %25 {offsets = [24, 0], sizes = [8, 256], strides = [1, 1]} : vector<72x256xf32> to vector<8x256xf32>
    %cst_27 = arith.constant 0.000000e+00 : f32
    %72 = vector.broadcast %cst_27 : f32 to vector<8x1xf32>
    %73 = vector.extract_strided_slice %71 {offsets = [0, 0], sizes = [8, 255], strides = [1, 1]} : vector<8x256xf32> to vector<8x255xf32>
    %74 = tpu.concatenate %72, %73 in 1 : vector<8x1xf32>, vector<8x255xf32> -> vector<8x256xf32>
    %cst_28 = arith.constant 0.000000e+00 : f32
    %75 = vector.shape_cast %44 : vector<1x256xi1> to vector<1x256xi1>
    %76 = vector.broadcast %75 : vector<1x256xi1> to vector<8x256xi1>
    %77 = vector.broadcast %cst_28 : f32 to vector<8x256xf32>
    %78 = arith.select %76, %74, %77 : vector<8x256xi1>, vector<8x256xf32>
    %79 = arith.addf %70, %78 : vector<8x256xf32>
    %80 = vector.extract_strided_slice %25 {offsets = [32, 0], sizes = [8, 256], strides = [1, 1]} : vector<72x256xf32> to vector<8x256xf32>
    %81 = arith.addf %79, %80 : vector<8x256xf32>
    %82 = vector.extract_strided_slice %25 {offsets = [40, 0], sizes = [8, 256], strides = [1, 1]} : vector<72x256xf32> to vector<8x256xf32>
    %83 = vector.extract_strided_slice %82 {offsets = [0, 1], sizes = [8, 255], strides = [1, 1]} : vector<8x256xf32> to vector<8x255xf32>
    %cst_29 = arith.constant 0.000000e+00 : f32
    %84 = vector.broadcast %cst_29 : f32 to vector<8x1xf32>
    %85 = tpu.concatenate %83, %84 in 1 : vector<8x255xf32>, vector<8x1xf32> -> vector<8x256xf32>
    %cst_30 = arith.constant 0.000000e+00 : f32
    %86 = vector.shape_cast %46 : vector<1x256xi1> to vector<1x256xi1>
    %87 = vector.broadcast %86 : vector<1x256xi1> to vector<8x256xi1>
    %88 = vector.broadcast %cst_30 : f32 to vector<8x256xf32>
    %89 = arith.select %87, %85, %88 : vector<8x256xi1>, vector<8x256xf32>
    %90 = arith.addf %81, %89 : vector<8x256xf32>
    %91 = vector.extract_strided_slice %25 {offsets = [48, 0], sizes = [8, 256], strides = [1, 1]} : vector<72x256xf32> to vector<8x256xf32>
    %92 = vector.extract_strided_slice %91 {offsets = [0, 15], sizes = [8, 241], strides = [1, 1]} : vector<8x256xf32> to vector<8x241xf32>
    %cst_31 = arith.constant 0.000000e+00 : f32
    %93 = vector.broadcast %cst_31 : f32 to vector<8x15xf32>
    %94 = tpu.concatenate %92, %93 in 1 : vector<8x241xf32>, vector<8x15xf32> -> vector<8x256xf32>
    %cst_32 = arith.constant 0.000000e+00 : f32
    %95 = vector.shape_cast %44 : vector<1x256xi1> to vector<1x256xi1>
    %96 = vector.broadcast %95 : vector<1x256xi1> to vector<8x256xi1>
    %97 = vector.broadcast %cst_32 : f32 to vector<8x256xf32>
    %98 = arith.select %96, %94, %97 : vector<8x256xi1>, vector<8x256xf32>
    %99 = arith.addf %90, %98 : vector<8x256xf32>
    %100 = vector.extract_strided_slice %25 {offsets = [56, 0], sizes = [8, 256], strides = [1, 1]} : vector<72x256xf32> to vector<8x256xf32>
    %101 = vector.extract_strided_slice %100 {offsets = [0, 16], sizes = [8, 240], strides = [1, 1]} : vector<8x256xf32> to vector<8x240xf32>
    %cst_33 = arith.constant 0.000000e+00 : f32
    %102 = vector.broadcast %cst_33 : f32 to vector<8x16xf32>
    %103 = tpu.concatenate %101, %102 in 1 : vector<8x240xf32>, vector<8x16xf32> -> vector<8x256xf32>
    %104 = arith.addf %99, %103 : vector<8x256xf32>
    %105 = vector.extract_strided_slice %25 {offsets = [64, 0], sizes = [8, 256], strides = [1, 1]} : vector<72x256xf32> to vector<8x256xf32>
    %106 = vector.extract_strided_slice %105 {offsets = [0, 17], sizes = [8, 239], strides = [1, 1]} : vector<8x256xf32> to vector<8x239xf32>
    %cst_34 = arith.constant 0.000000e+00 : f32
    %107 = vector.broadcast %cst_34 : f32 to vector<8x17xf32>
    %108 = tpu.concatenate %106, %107 in 1 : vector<8x239xf32>, vector<8x17xf32> -> vector<8x256xf32>
    %cst_35 = arith.constant 0.000000e+00 : f32
    %109 = vector.shape_cast %46 : vector<1x256xi1> to vector<1x256xi1>
    %110 = vector.broadcast %109 : vector<1x256xi1> to vector<8x256xi1>
    %111 = vector.broadcast %cst_35 : f32 to vector<8x256xf32>
    %112 = arith.select %110, %108, %111 : vector<8x256xi1>, vector<8x256xf32>
    %113 = arith.addf %104, %112 : vector<8x256xf32>
    %114 = vector.shape_cast %113 : vector<8x256xf32> to vector<1x8x256xf32>
    %c0_36 = arith.constant 0 : index
    %c0_37 = arith.constant 0 : index
    %c0_38 = arith.constant 0 : index
    %115 = vector.load %arg8[%c0_36, %c0_37, %c0_38] : memref<1x8x256xf32, #tpu.memory_space<vmem>>, vector<1x8x256xf32>
    tpu.vector_store %arg8[%c0_36, %c0_37, %c0_38], %114 {strides = array<i32>} : memref<1x8x256xf32, #tpu.memory_space<vmem>>, vector<1x8x256xf32>,
    return
  }
  func.func @transform_0(%arg0: i32) -> (i32, i32, i32) {
    %c0_i32 = arith.constant 0 : i32
    %c0_i32_0 = arith.constant 0 : i32
    %c0_i32_1 = arith.constant 0 : i32
    return %arg0, %c0_i32, %c0_i32_0 : i32, i32, i32
  }
  func.func @transform_1(%arg0: i32) -> (i32, i32) {
    %c0_i32 = arith.constant 0 : i32
    %c0_i32_0 = arith.constant 0 : i32
    %c0_i32_1 = arith.constant 0 : i32
    return %c0_i32, %c0_i32_0 : i32, i32
  }
  func.func @transform_2(%arg0: i32) -> (i32, i32) {
    %c0_i32 = arith.constant 0 : i32
    %c0_i32_0 = arith.constant 0 : i32
    %c0_i32_1 = arith.constant 0 : i32
    return %c0_i32, %c0_i32_0 : i32, i32
  }
  func.func @transform_3(%arg0: i32) -> (i32, i32) {
    %c0_i32 = arith.constant 0 : i32
    %c0_i32_0 = arith.constant 0 : i32
    %c0_i32_1 = arith.constant 0 : i32
    return %c0_i32, %c0_i32_0 : i32, i32
  }
  func.func @transform_4(%arg0: i32) -> (i32, i32) {
    %c0_i32 = arith.constant 0 : i32
    %c0_i32_0 = arith.constant 0 : i32
    %c0_i32_1 = arith.constant 0 : i32
    return %c0_i32, %c0_i32_0 : i32, i32
  }
  func.func @transform_5(%arg0: i32) -> (i32, i32) {
    %c0_i32 = arith.constant 0 : i32
    %c0_i32_0 = arith.constant 0 : i32
    %c0_i32_1 = arith.constant 0 : i32
    return %c0_i32, %c0_i32_0 : i32, i32
  }
  func.func @transform_6(%arg0: i32) -> (i32, i32) {
    %c0_i32 = arith.constant 0 : i32
    %c0_i32_0 = arith.constant 0 : i32
    %c0_i32_1 = arith.constant 0 : i32
    return %c0_i32, %c0_i32_0 : i32, i32
  }
  func.func @transform_7(%arg0: i32) -> (i32, i32, i32) {
    %c2_i32 = arith.constant 2 : i32
    %c0_i32 = arith.constant 0 : i32
    %c0_i32_0 = arith.constant 0 : i32
    return %arg0, %c2_i32, %c0_i32 : i32, i32, i32
  }
}

module attributes {stable_mosaic.version = 11 : i64} {
  func.func @_dense_layer_kernel(%arg0: i32, %arg1: memref<1x8x256xf32, #tpu.memory_space<vmem>>, %arg2: memref<8x1xf32, #tpu.memory_space<vmem>>, %arg3: memref<8x1xf32, #tpu.memory_space<vmem>>, %arg4: memref<32x8xf32, #tpu.memory_space<vmem>>, %arg5: memref<32x1xf32, #tpu.memory_space<vmem>>, %arg6: memref<32x1xf32, #tpu.memory_space<vmem>>, %arg7: memref<72x32xf32, #tpu.memory_space<vmem>>, %arg8: memref<1x8x256xf32, #tpu.memory_space<vmem>>) attributes {dimension_semantics = [#tpu.dimension_semantics<parallel>], iteration_bounds = array<i64: 2>, scalar_prefetch = 0 : i64, scratch_operands = 0 : i64, tpu.core_type = #tpu.core_type<tc>, window_params = [{transform_indices = @transform_0, window_bounds = array<i64: 1, 8, 256>}, {pipeline_mode = #tpu.pipeline_mode<synchronous>, transform_indices = @transform_1, window_bounds = array<i64: 8, 1>}, {pipeline_mode = #tpu.pipeline_mode<synchronous>, transform_indices = @transform_2, window_bounds = array<i64: 8, 1>}, {pipeline_mode = #tpu.pipeline_mode<synchronous>, transform_indices = @transform_3, window_bounds = array<i64: 32, 8>}, {pipeline_mode = #tpu.pipeline_mode<synchronous>, transform_indices = @transform_4, window_bounds = array<i64: 32, 1>}, {pipeline_mode = #tpu.pipeline_mode<synchronous>, transform_indices = @transform_5, window_bounds = array<i64: 32, 1>}, {pipeline_mode = #tpu.pipeline_mode<synchronous>, transform_indices = @transform_6, window_bounds = array<i64: 72, 32>}, {transform_indices = @transform_7, window_bounds = array<i64: 1, 8, 256>}]} {
    %c0 = arith.constant 0 : index
    %c0_0 = arith.constant 0 : index
    %c0_1 = arith.constant 0 : index
    %0 = vector.load %arg1[%c0, %c0_0, %c0_1] : memref<1x8x256xf32, #tpu.memory_space<vmem>>, vector<1x8x256xf32>
    %1 = vector.shape_cast %0 : vector<1x8x256xf32> to vector<8x256xf32>
    %c0_2 = arith.constant 0 : index
    %c0_3 = arith.constant 0 : index
    %2 = vector.load %arg2[%c0_2, %c0_3] : memref<8x1xf32, #tpu.memory_space<vmem>>, vector<8x1xf32>
    %3 = vector.broadcast %2 : vector<8x1xf32> to vector<8x256xf32>
    %4 = arith.mulf %1, %3 : vector<8x256xf32>
    %c0_4 = arith.constant 0 : index
    %c0_5 = arith.constant 0 : index
    %5 = vector.load %arg3[%c0_4, %c0_5] : memref<8x1xf32, #tpu.memory_space<vmem>>, vector<8x1xf32>
    %6 = vector.broadcast %5 : vector<8x1xf32> to vector<8x256xf32>
    %7 = arith.addf %4, %6 : vector<8x256xf32>
    %cst = arith.constant 0.000000e+00 : f32
    %8 = vector.broadcast %cst : f32 to vector<8x256xf32>
    %9 = arith.maximumf %7, %8 : vector<8x256xf32>
    %c0_6 = arith.constant 0 : index
    %c0_7 = arith.constant 0 : index
    %10 = vector.load %arg4[%c0_6, %c0_7] : memref<32x8xf32, #tpu.memory_space<vmem>>, vector<32x8xf32>
    %11 = arith.truncf %10 : vector<32x8xf32> to vector<32x8xbf16>
    %12 = arith.truncf %9 : vector<8x256xf32> to vector<8x256xbf16>
    %cst_8 = arith.constant dense<0.000000e+00> : vector<32x256xf32>
    %13 = tpu.matmul %11, %12, %cst_8 {dimension_numbers = #tpu.dot_dimension_numbers<[1], [0], [0], [1], [0, 0, 1, 1], [], []>} : vector<32x8xbf16>, vector<8x256xbf16>, vector<32x256xf32> -> vector<32x256xf32>
    %c0_9 = arith.constant 0 : index
    %c0_10 = arith.constant 0 : index
    %14 = vector.load %arg5[%c0_9, %c0_10] : memref<32x1xf32, #tpu.memory_space<vmem>>, vector<32x1xf32>
    %15 = vector.broadcast %14 : vector<32x1xf32> to vector<32x256xf32>
    %16 = arith.mulf %13, %15 : vector<32x256xf32>
    %c0_11 = arith.constant 0 : index
    %c0_12 = arith.constant 0 : index
    %17 = vector.load %arg6[%c0_11, %c0_12] : memref<32x1xf32, #tpu.memory_space<vmem>>, vector<32x1xf32>
    %18 = vector.broadcast %17 : vector<32x1xf32> to vector<32x256xf32>
    %19 = arith.addf %16, %18 : vector<32x256xf32>
    %cst_13 = arith.constant 0.000000e+00 : f32
    %20 = vector.broadcast %cst_13 : f32 to vector<32x256xf32>
    %21 = arith.maximumf %19, %20 : vector<32x256xf32>
    %c0_14 = arith.constant 0 : index
    %c0_15 = arith.constant 0 : index
    %22 = vector.load %arg7[%c0_14, %c0_15] : memref<72x32xf32, #tpu.memory_space<vmem>>, vector<72x32xf32>
    %23 = arith.truncf %22 : vector<72x32xf32> to vector<72x32xbf16>
    %24 = arith.truncf %21 : vector<32x256xf32> to vector<32x256xbf16>
    %cst_16 = arith.constant dense<0.000000e+00> : vector<72x256xf32>
    %25 = tpu.matmul %23, %24, %cst_16 {dimension_numbers = #tpu.dot_dimension_numbers<[1], [0], [0], [1], [0, 0, 1, 1], [], []>} : vector<72x32xbf16>, vector<32x256xbf16>, vector<72x256xf32> -> vector<72x256xf32>
    %26 = tpu.iota {dimensions = array<i32: 1>} : vector<1x256xi32>
    %c16_i32 = arith.constant 16 : i32
    %c0_i32 = arith.constant 0 : i32
    %27 = arith.cmpi eq, %c16_i32, %c0_i32 : i32
    %c1_i32 = arith.constant 1 : i32
    %28 = arith.select %27, %c1_i32, %c16_i32 : i32
    %29 = vector.broadcast %28 : i32 to vector<1x256xi32>
    %30 = arith.remsi %26, %29 : vector<1x256xi32>
    %c0_i32_17 = arith.constant 0 : i32
    %31 = vector.broadcast %c0_i32_17 : i32 to vector<1x256xi32>
    %32 = arith.cmpi ne, %30, %31 : vector<1x256xi32>
    %c0_i32_18 = arith.constant 0 : i32
    %33 = vector.broadcast %c0_i32_18 : i32 to vector<1x256xi32>
    %34 = arith.cmpi slt, %30, %33 : vector<1x256xi32>
    %c0_i32_19 = arith.constant 0 : i32
    %35 = arith.cmpi slt, %28, %c0_i32_19 : i32
    %36 = vector.broadcast %35 : i1 to vector<1x256xi1>
    %37 = vector.broadcast %36 : vector<1x256xi1> to vector<1x256xi1>
    %38 = arith.xori %34, %37 : vector<1x256xi1>
    %39 = arith.andi %38, %32 : vector<1x256xi1>
    %40 = vector.broadcast %28 : i32 to vector<1x256xi32>
    %41 = arith.addi %30, %40 : vector<1x256xi32>
    %42 = arith.select %39, %41, %30 : vector<1x256xi1>, vector<1x256xi32>
    %c1_i32_20 = arith.constant 1 : i32
    %43 = vector.broadcast %c1_i32_20 : i32 to vector<1x256xi32>
    %44 = arith.cmpi sge, %42, %43 : vector<1x256xi32>
    %c14_i32 = arith.constant 14 : i32
    %45 = vector.broadcast %c14_i32 : i32 to vector<1x256xi32>
    %46 = arith.cmpi sle, %42, %45 : vector<1x256xi32>
    %cst_21 = arith.constant 0.000000e+00 : f32
    %47 = vector.broadcast %cst_21 : f32 to vector<8x256xf32>
    %48 = vector.extract_strided_slice %25 {offsets = [0, 0], sizes = [8, 256], strides = [1, 1]} : vector<72x256xf32> to vector<8x256xf32>
    %cst_22 = arith.constant 0.000000e+00 : f32
    %49 = vector.broadcast %cst_22 : f32 to vector<8x17xf32>
    %50 = vector.extract_strided_slice %48 {offsets = [0, 0], sizes = [8, 239], strides = [1, 1]} : vector<8x256xf32> to vector<8x239xf32>
    %51 = tpu.concatenate %49, %50 in 1 : vector<8x17xf32>, vector<8x239xf32> -> vector<8x256xf32>
    %cst_23 = arith.constant 0.000000e+00 : f32
    %52 = vector.shape_cast %44 : vector<1x256xi1> to vector<1x256xi1>
    %53 = vector.broadcast %52 : vector<1x256xi1> to vector<8x256xi1>
    %54 = vector.broadcast %cst_23 : f32 to vector<8x256xf32>
    %55 = arith.select %53, %51, %54 : vector<8x256xi1>, vector<8x256xf32>
    %56 = arith.addf %47, %55 : vector<8x256xf32>
    %57 = vector.extract_strided_slice %25 {offsets = [8, 0], sizes = [8, 256], strides = [1, 1]} : vector<72x256xf32> to vector<8x256xf32>
    %cst_24 = arith.constant 0.000000e+00 : f32
    %58 = vector.broadcast %cst_24 : f32 to vector<8x16xf32>
    %59 = vector.extract_strided_slice %57 {offsets = [0, 0], sizes = [8, 240], strides = [1, 1]} : vector<8x256xf32> to vector<8x240xf32>
    %60 = tpu.concatenate %58, %59 in 1 : vector<8x16xf32>, vector<8x240xf32> -> vector<8x256xf32>
    %61 = arith.addf %56, %60 : vector<8x256xf32>
    %62 = vector.extract_strided_slice %25 {offsets = [16, 0], sizes = [8, 256], strides = [1, 1]} : vector<72x256xf32> to vector<8x256xf32>
    %cst_25 = arith.constant 0.000000e+00 : f32
    %63 = vector.broadcast %cst_25 : f32 to vector<8x15xf32>
    %64 = vector.extract_strided_slice %62 {offsets = [0, 0], sizes = [8, 241], strides = [1, 1]} : vector<8x256xf32> to vector<8x241xf32>
    %65 = tpu.concatenate %63, %64 in 1 : vector<8x15xf32>, vector<8x241xf32> -> vector<8x256xf32>
    %cst_26 = arith.constant 0.000000e+00 : f32
    %66 = vector.shape_cast %46 : vector<1x256xi1> to vector<1x256xi1>
    %67 = vector.broadcast %66 : vector<1x256xi1> to vector<8x256xi1>
    %68 = vector.broadcast %cst_26 : f32 to vector<8x256xf32>
    %69 = arith.select %67, %65, %68 : vector<8x256xi1>, vector<8x256xf32>
    %70 = arith.addf %61, %69 : vector<8x256xf32>
    %71 = vector.extract_strided_slice %25 {offsets = [24, 0], sizes = [8, 256], strides = [1, 1]} : vector<72x256xf32> to vector<8x256xf32>
    %cst_27 = arith.constant 0.000000e+00 : f32
    %72 = vector.broadcast %cst_27 : f32 to vector<8x1xf32>
    %73 = vector.extract_strided_slice %71 {offsets = [0, 0], sizes = [8, 255], strides = [1, 1]} : vector<8x256xf32> to vector<8x255xf32>
    %74 = tpu.concatenate %72, %73 in 1 : vector<8x1xf32>, vector<8x255xf32> -> vector<8x256xf32>
    %cst_28 = arith.constant 0.000000e+00 : f32
    %75 = vector.shape_cast %44 : vector<1x256xi1> to vector<1x256xi1>
    %76 = vector.broadcast %75 : vector<1x256xi1> to vector<8x256xi1>
    %77 = vector.broadcast %cst_28 : f32 to vector<8x256xf32>
    %78 = arith.select %76, %74, %77 : vector<8x256xi1>, vector<8x256xf32>
    %79 = arith.addf %70, %78 : vector<8x256xf32>
    %80 = vector.extract_strided_slice %25 {offsets = [32, 0], sizes = [8, 256], strides = [1, 1]} : vector<72x256xf32> to vector<8x256xf32>
    %81 = arith.addf %79, %80 : vector<8x256xf32>
    %82 = vector.extract_strided_slice %25 {offsets = [40, 0], sizes = [8, 256], strides = [1, 1]} : vector<72x256xf32> to vector<8x256xf32>
    %83 = vector.extract_strided_slice %82 {offsets = [0, 1], sizes = [8, 255], strides = [1, 1]} : vector<8x256xf32> to vector<8x255xf32>
    %cst_29 = arith.constant 0.000000e+00 : f32
    %84 = vector.broadcast %cst_29 : f32 to vector<8x1xf32>
    %85 = tpu.concatenate %83, %84 in 1 : vector<8x255xf32>, vector<8x1xf32> -> vector<8x256xf32>
    %cst_30 = arith.constant 0.000000e+00 : f32
    %86 = vector.shape_cast %46 : vector<1x256xi1> to vector<1x256xi1>
    %87 = vector.broadcast %86 : vector<1x256xi1> to vector<8x256xi1>
    %88 = vector.broadcast %cst_30 : f32 to vector<8x256xf32>
    %89 = arith.select %87, %85, %88 : vector<8x256xi1>, vector<8x256xf32>
    %90 = arith.addf %81, %89 : vector<8x256xf32>
    %91 = vector.extract_strided_slice %25 {offsets = [48, 0], sizes = [8, 256], strides = [1, 1]} : vector<72x256xf32> to vector<8x256xf32>
    %92 = vector.extract_strided_slice %91 {offsets = [0, 15], sizes = [8, 241], strides = [1, 1]} : vector<8x256xf32> to vector<8x241xf32>
    %cst_31 = arith.constant 0.000000e+00 : f32
    %93 = vector.broadcast %cst_31 : f32 to vector<8x15xf32>
    %94 = tpu.concatenate %92, %93 in 1 : vector<8x241xf32>, vector<8x15xf32> -> vector<8x256xf32>
    %cst_32 = arith.constant 0.000000e+00 : f32
    %95 = vector.shape_cast %44 : vector<1x256xi1> to vector<1x256xi1>
    %96 = vector.broadcast %95 : vector<1x256xi1> to vector<8x256xi1>
    %97 = vector.broadcast %cst_32 : f32 to vector<8x256xf32>
    %98 = arith.select %96, %94, %97 : vector<8x256xi1>, vector<8x256xf32>
    %99 = arith.addf %90, %98 : vector<8x256xf32>
    %100 = vector.extract_strided_slice %25 {offsets = [56, 0], sizes = [8, 256], strides = [1, 1]} : vector<72x256xf32> to vector<8x256xf32>
    %101 = vector.extract_strided_slice %100 {offsets = [0, 16], sizes = [8, 240], strides = [1, 1]} : vector<8x256xf32> to vector<8x240xf32>
    %cst_33 = arith.constant 0.000000e+00 : f32
    %102 = vector.broadcast %cst_33 : f32 to vector<8x16xf32>
    %103 = tpu.concatenate %101, %102 in 1 : vector<8x240xf32>, vector<8x16xf32> -> vector<8x256xf32>
    %104 = arith.addf %99, %103 : vector<8x256xf32>
    %105 = vector.extract_strided_slice %25 {offsets = [64, 0], sizes = [8, 256], strides = [1, 1]} : vector<72x256xf32> to vector<8x256xf32>
    %106 = vector.extract_strided_slice %105 {offsets = [0, 17], sizes = [8, 239], strides = [1, 1]} : vector<8x256xf32> to vector<8x239xf32>
    %cst_34 = arith.constant 0.000000e+00 : f32
    %107 = vector.broadcast %cst_34 : f32 to vector<8x17xf32>
    %108 = tpu.concatenate %106, %107 in 1 : vector<8x239xf32>, vector<8x17xf32> -> vector<8x256xf32>
    %cst_35 = arith.constant 0.000000e+00 : f32
    %109 = vector.shape_cast %46 : vector<1x256xi1> to vector<1x256xi1>
    %110 = vector.broadcast %109 : vector<1x256xi1> to vector<8x256xi1>
    %111 = vector.broadcast %cst_35 : f32 to vector<8x256xf32>
    %112 = arith.select %110, %108, %111 : vector<8x256xi1>, vector<8x256xf32>
    %113 = arith.addf %104, %112 : vector<8x256xf32>
    %114 = vector.shape_cast %113 : vector<8x256xf32> to vector<1x8x256xf32>
    %c0_36 = arith.constant 0 : index
    %c0_37 = arith.constant 0 : index
    %c0_38 = arith.constant 0 : index
    %115 = vector.load %arg8[%c0_36, %c0_37, %c0_38] : memref<1x8x256xf32, #tpu.memory_space<vmem>>, vector<1x8x256xf32>
    tpu.vector_store %arg8[%c0_36, %c0_37, %c0_38], %114 {strides = array<i32>} : memref<1x8x256xf32, #tpu.memory_space<vmem>>, vector<1x8x256xf32>,
    return
  }
  func.func @transform_0(%arg0: i32) -> (i32, i32, i32) {
    %c0_i32 = arith.constant 0 : i32
    %c0_i32_0 = arith.constant 0 : i32
    %c0_i32_1 = arith.constant 0 : i32
    return %arg0, %c0_i32, %c0_i32_0 : i32, i32, i32
  }
  func.func @transform_1(%arg0: i32) -> (i32, i32) {
    %c0_i32 = arith.constant 0 : i32
    %c0_i32_0 = arith.constant 0 : i32
    %c0_i32_1 = arith.constant 0 : i32
    return %c0_i32, %c0_i32_0 : i32, i32
  }
  func.func @transform_2(%arg0: i32) -> (i32, i32) {
    %c0_i32 = arith.constant 0 : i32
    %c0_i32_0 = arith.constant 0 : i32
    %c0_i32_1 = arith.constant 0 : i32
    return %c0_i32, %c0_i32_0 : i32, i32
  }
  func.func @transform_3(%arg0: i32) -> (i32, i32) {
    %c0_i32 = arith.constant 0 : i32
    %c0_i32_0 = arith.constant 0 : i32
    %c0_i32_1 = arith.constant 0 : i32
    return %c0_i32, %c0_i32_0 : i32, i32
  }
  func.func @transform_4(%arg0: i32) -> (i32, i32) {
    %c0_i32 = arith.constant 0 : i32
    %c0_i32_0 = arith.constant 0 : i32
    %c0_i32_1 = arith.constant 0 : i32
    return %c0_i32, %c0_i32_0 : i32, i32
  }
  func.func @transform_5(%arg0: i32) -> (i32, i32) {
    %c0_i32 = arith.constant 0 : i32
    %c0_i32_0 = arith.constant 0 : i32
    %c0_i32_1 = arith.constant 0 : i32
    return %c0_i32, %c0_i32_0 : i32, i32
  }
  func.func @transform_6(%arg0: i32) -> (i32, i32) {
    %c0_i32 = arith.constant 0 : i32
    %c0_i32_0 = arith.constant 0 : i32
    %c0_i32_1 = arith.constant 0 : i32
    return %c0_i32, %c0_i32_0 : i32, i32
  }
  func.func @transform_7(%arg0: i32) -> (i32, i32, i32) {
    %c1_i32 = arith.constant 1 : i32
    %c0_i32 = arith.constant 0 : i32
    %c0_i32_0 = arith.constant 0 : i32
    return %arg0, %c1_i32, %c0_i32 : i32, i32, i32
  }
}

</mosaic_0001>

<bundles_post_ra>
// kernel: dense_block_forward.2
= control target key start
LH: loop header
LB: loop body
LE: loop exit
PB: predicated region body
PF: predicated region fallthrough
CT: control target
= control target key end

     0   :  { %s888_s24 = smov 0   ;;  %s1047_s0 = inlined_call_operand.vmem [shape: f32[2,24,256], index: 0, kind: input, shape index: {}, may-alias: {0,7}]   ;;  %s1048_s1 = inlined_call_operand.vmem [shape: f32[8,1], index: 1, kind: input, shape index: {}]   ;;  %s1049_s2 = inlined_call_operand.vmem [shape: f32[8,1], index: 2, kind: input, shape index: {}]   ;;  %s1050_s3 = inlined_call_operand.vmem [shape: f32[32,8], index: 3, kind: input, shape index: {}]   ;;  %s1051_s4 = inlined_call_operand.vmem [shape: f32[32,1], index: 4, kind: input, shape index: {}]   ;;  %s1052_s5 = inlined_call_operand.vmem [shape: f32[32,1], index: 5, kind: input, shape index: {}]   ;;  %s1053_s6 = inlined_call_operand.vmem [shape: f32[72,32], index: 6, kind: input, shape index: {}]   ;;  %s1054_s7 = inlined_call_operand.vmem [shape: f32[2,24,256], index: 7, kind: output, shape index: {}, may-alias: {0,7}]  }
   0x1 LB: > { %s788_s25 = sadd.s32 4294967295, %s837_s24   ;;  %p792_p0 = scmp.ge.s32.totalorder %s837_s24, 1  ;;  %s837_s24 = sphi %s888_s24, %s17_s24  }
   0x2   : > { %p237_p1 = scmp.lt.s32.totalorder %s837_s24, 3 }
   0x4   : > { %p238_p2 = pnand %p792_p0, %p237_p1 }
   0x5   : > { %p270_p3 = scmp.lt.s32.totalorder (!%p238_p2), %s788_s25, 1  ;;  %s840_s12 = smov (!%p238_p2), 17  }
   0x6   : > { %241 = sbr.rel (%p238_p2) target bundleno = 717 (0x2cd), region = 48  ;;  %s841_s13 = smov (!%p238_p2), 15  }
   0x7   : > { %s842_s14 = smov (!%p238_p2), 16   ;;  %s843_s15 = smov (!%p238_p2), 1  }
   0x8   : > { %s844_s16 = smov (!%p238_p2), 127   ;;  %s845_s17 = smov (!%p238_p2), 113  }
   0x9   : > { %s846_s18 = smov (!%p238_p2), 112   ;;  %s847_s19 = smov (!%p238_p2), 111  }
   0xb   : > { %v284_v0 = vld [vmem:[%s1048_s1] sm:$0xff]  ;;  %v839_v1 = vmov 0   ;;  %v411_v3 = vld [vmem:[%s1052_s5 + $0x10] sm:$0xff]  ;;  %v380_v7 = vld [vmem:[%s1051_s4 + $0x18] sm:$0xff]  ;;  %s1064_s25 = smov (!%p270_p3, %s788_s25), 1  ;;  %vm317_vm0 = vcmask 1043456  }
   0xc   : > { %829 = vset.pattern.permute.xlu0 %v839_v1  ;;  %356 = vmatprep.mubr.bf16.mxu0 %v839_v1  ;;  %v292_v2 = vld [vmem:[%s1049_s2] sm:$0xff]  ;;  %v379_v6 = vld [vmem:[%s1051_s4 + $0x10] sm:$0xff]  ;;  %v412_v8 = vld [vmem:[%s1052_s5 + $0x18] sm:$0xff]  ;;  %s811_s23 = smul.u32 48, %s1064_s25  ;;  %vm310_vm1 = vcmask 64512   ;;  %vm467_vm2 = vcmask 261120  }
   0xd   : > { %287 = vperm.xlu0 %829, %v284_v0   ;;  %830 = vset.pattern.permute.xlu1 %v839_v1  ;;  %v377_v4 = vld [vmem:[%s1051_s4] sm:$0xff]  ;;  %v378_v9 = vld [vmem:[%s1051_s4 + $0x8] sm:$0xff]  ;;  %v304_v27 = vld [vmem:[%s1050_s3 + $0x10] sm:$0xff]  ;;  %vm601_vm3 = vcmask 138240   ;;  %vm620_vm4 = vcmask 130048   ;;  %vm633_vm7 = vcmask 121856  }
   0xe   : > { %525 = vmatprep.mubr.bf16.mxu1 %v839_v1  ;;  %v409_v5 = vld [vmem:[%s1052_s5] sm:$0xff]  ;;  %393 = vperm.xlu1 %830, %v379_v6   ;;  %v410_v10 = vld [vmem:[%s1052_s5 + $0x8] sm:$0xff]  ;;  %s274_s28 = scalar_lea.vmem %s1047_s0, %s811_s23  ;;  %v305_v28 = vld [vmem:[%s1050_s3 + $0x18] sm:$0xff]  ;;  %vm652_vm10 = vcmask 7168   ;;  %vm669_vm11 = vcmask 1039360   ;;  %vm684_vm12 = vcmask 924672   ;;  %s758_s22 = scalar_lea.vmem %s1054_s7, %s811_s23 }
   0xf   : > { %v282_v12 = vld [vmem:[%s274_s28] sm:$0xff]  ;;  %v283_v13 = vld [vmem:[%s274_s28 + $0x8] sm:$0xff]  ;;  %v307_v29 = vpack.c.bf16 %v305_v28, %v304_v27  ;;  %vm699_vm13 = vcmask 916480   ;;  %vm712_vm14 = vcmask 908288  }
  0x10   : > { %v302_v21 = vld [vmem:[%s1050_s3] sm:$0xff]  ;;  %v303_v22 = vld [vmem:[%s1050_s3 + $0x8] sm:$0xff] }
  0x11   : > { %295 = vperm.xlu0 %829, %v292_v2   ;;  %v306_v26 = vpack.c.bf16 %v303_v22, %v302_v21  ;;  %v456_v21 = vld [vmem:[%s1053_s6 + $0x38] sm:$0xff] }
  0x12   : > { %398 = vperm.xlu1 %830, %v380_v7  }
  0x15   : > { %425 = vperm.xlu0 %829, %v411_v3  }
  0x16   : > { %430 = vperm.xlu1 %830, %v412_v8  }
  0x19   : > { %383 = vperm.xlu0 %829, %v377_v4  }
  0x1a   : > { %388 = vperm.xlu1 %830, %v378_v9   ;;  %v449_v9 = vld [vmem:[%s1053_s6] sm:$0xff] }
  0x1d   : > { %415 = vperm.xlu0 %829, %v409_v5  }
  0x1e   : > { %420 = vperm.xlu1 %830, %v410_v10  }
  0x88   : > { %v288_v11 = vpop.permute.xlu0 %287 }
  0x89   : > { %v290_v14 = vmul.f32 %v288_v11, %v282_v12  ;;  %v291_v15 = vmul.f32 %v288_v11, %v283_v13  ;;  %v394_v30 = vpop.permute.xlu1 %393  ;;  %v450_v11 = vld [vmem:[%s1053_s6 + $0x8] sm:$0xff]  ;;  %v451_v12 = vld [vmem:[%s1053_s6 + $0x10] sm:$0xff]  ;;  %v452_v13 = vld [vmem:[%s1053_s6 + $0x18] sm:$0xff] }
  0x8c   : > { %v296_v16 = vpop.permute.xlu0 %295 }
  0x8d   : > { %v298_v17 = vadd.f32 %v296_v16, %v290_v14  ;;  %v299_v18 = vadd.f32 %v296_v16, %v291_v15  ;;  %v399_v31 = vpop.permute.xlu1 %398  ;;  %v458_v15 = vpack.c.bf16 %v450_v11, %v449_v9  ;;  %v459_v16 = vpack.c.bf16 %v452_v13, %v451_v12 }
  0x8f   : > { %v300_v19 = vmax.f32 %v298_v17, 0.0  ;;  %v301_v20 = vmax.f32 %v299_v18, 0.0  ;;  %v453_v17 = vld [vmem:[%s1053_s6 + $0x20] sm:$0xff]  ;;  %v454_v18 = vld [vmem:[%s1053_s6 + $0x28] sm:$0xff] }
  0x90   : > { %v426_v35 = vpop.permute.xlu0 %425 }
  0x91   : > { %v309_v23 = vpack.c.bf16 %v301_v20, %v301_v20  ;;  %v308_v24 = vpack.c.bf16 %v300_v19, %v300_v19  ;;  %v431_v33 = vpop.permute.xlu1 %430  ;;  %v460_v19 = vpack.c.bf16 %v454_v18, %v453_v17  ;;  %v455_v20 = vld [vmem:[%s1053_s6 + $0x30] sm:$0xff] }
  0x92   : > { %v461_v22 = vpack.c.bf16 %v456_v21, %v455_v20 }
  0x93   : > { %795 = vmatprep.subr.msk.bf16.mxu0 %vm317_vm0, %v309_v23  ;;  %v319_v25 = vsel %vm317_vm0, %v308_v24, 0  ;;  %v457_v23 = vld [vmem:[%s1053_s6 + $0x40] sm:$0xff] }
  0x94   : > { %339 = vmatpush1.bf16.msra.mxu0 %v319_v25  ;;  %v384_v40 = vpop.permute.xlu0 %383  ;;  %v462_v24 = vpack.c.bf16 %v457_v23, %v457_v23 }
  0x95   : > { %v389_v38 = vpop.permute.xlu1 %388 }
  0x97   : > { %796 = vmatmul.mubr.msk.bf16.vlgmr.msra.gmra.mxu0 %vm310_vm1, %v306_v26 }
  0x98   : > { %366 = vmatprep.mubr.bf16.mxu0 %v839_v1  ;;  %v416_v55 = vpop.permute.xlu0 %415 }
  0x99   : > { %v421_v49 = vpop.permute.xlu1 %420 }
  0x9f   : > { %797 = vmatmul.mubr.msk.bf16.gmra.mxu0 %vm310_vm1, %v307_v29 }
  0xa0   : > { %515 = vmatprep.mubr.bf16.mxu0 %v839_v1 }
 0x157   : > { %v358_v32 = vpop.f32.mrf.mxu0 }
 0x158   : > { %v401_v56 = vmul.f32 %v384_v40, %v358_v32 }
 0x159   : > { %v360_v34 = vpop.f32.mrf.mxu0 }
 0x15a   : > { %v402_v46 = vmul.f32 %v384_v40, %v360_v34  ;;  %v433_v2 = vadd.f32 %v416_v55, %v401_v56 }
 0x15b   : > { %v362_v36 = vpop.f32.mrf.mxu0 }
 0x15c   : > { %v403_v48 = vmul.f32 %v389_v38, %v362_v36  ;;  %v434_v58 = vadd.f32 %v416_v55, %v402_v46  ;;  %v441_v10 = vmax.f32 %v433_v2, 0.0 }
 0x15d   : > { %v364_v37 = vpop.f32.mrf.mxu0 }
 0x15e   : > { %v404_v42 = vmul.f32 %v389_v38, %v364_v37  ;;  %v435_v60 = vadd.f32 %v421_v49, %v403_v48  ;;  %v442_v4 = vmax.f32 %v434_v58, 0.0 }
 0x15f   : > { %v368_v39 = vpop.f32.mrf.mxu0 }
 0x160   : > { %v405_v44 = vmul.f32 %v394_v30, %v368_v39  ;;  %v436_v51 = vadd.f32 %v421_v49, %v404_v42  ;;  %v443_v6 = vmax.f32 %v435_v60, 0.0 }
 0x161   : > { %v370_v41 = vpop.f32.mrf.mxu0 }
 0x162   : > { %v406_v43 = vmul.f32 %v394_v30, %v370_v41  ;;  %v437_v57 = vadd.f32 %v426_v35, %v405_v44  ;;  %v444_v62 = vmax.f32 %v436_v51, 0.0  ;;  %v463_v14 = vpack.c.bf16 %v443_v6, %v441_v10 }
 0x163   : > { %v372_v45 = vpop.f32.mrf.mxu0  ;;  %v564_v44 = vlaneseq }
 0x164   : > { %v407_v47 = vmul.f32 %v399_v31, %v372_v45  ;;  %v438_v52 = vadd.f32 %v426_v35, %v406_v43  ;;  %v445_v3 = vmax.f32 %v437_v57, 0.0  ;;  %v464_v8 = vpack.c.bf16 %v444_v62, %v442_v4 }
 0x165   : > { %v374_v50 = vpop.f32.mrf.mxu0  ;;  %v565_v45 = vand.u32 127, %v564_v44 }
 0x166   : > { %v439_v53 = vadd.f32 %v431_v33, %v407_v47  ;;  %v408_v54 = vmul.f32 %v399_v31, %v374_v50  ;;  %v446_v63 = vmax.f32 %v438_v52, 0.0 }
 0x167   : > { %v566_v47 = vadd.s32 128, %v565_v45  ;;  %v571_v49 = vand.u32 15, %v565_v45 }
 0x168   : > { %v440_v59 = vadd.f32 %v431_v33, %v408_v54  ;;  %v447_v61 = vmax.f32 %v439_v53, 0.0 }
 0x169   : > { %v578_v50 = vand.u32 15, %v566_v47  ;;  %vm995_vm5 = vcmp.ge.s32.totalorder %v571_v49, 1  ;;  %vm1003_vm8 = vcmp.le.s32.totalorder %v571_v49, 14 }
 0x16a   : > { %v448_v0 = vmax.f32 %v440_v59, 0.0  ;;  %v465_v7 = vpack.c.bf16 %v447_v61, %v445_v3 }
 0x16b   : > { %vm999_vm6 = vcmp.ge.s32.totalorder %v578_v50, 1  ;;  %vm1010_vm9 = vcmp.le.s32.totalorder %v578_v50, 14 }
 0x16c   : > { %v466_v5 = vpack.c.bf16 %v448_v0, %v446_v63 }
 0x16e   : > { %495 = vmatprep.subr.bf16.mxu0 %v466_v5  ;;  %807 = vmatprep.subr.bf16.mxu1 %v466_v5 }
 0x16f   : > { %496 = vmatpush1.bf16.msra.mxu0 %v465_v7  ;;  %809 = vmatpush1.bf16.msra.mxu1 %v465_v7 }
 0x170   : > { %497 = vmatprep.subr.bf16.mxu0 %v464_v8  ;;  %808 = vmatprep.subr.bf16.mxu1 %v464_v8 }
 0x173   : > { %498 = vmatpush1.bf16.msra.mxu0 %v463_v14  ;;  %810 = vmatpush1.bf16.msra.mxu1 %v463_v14 }
 0x176   : > { %798 = vmatmul.mubr.msk.bf16.vlgmr.msra.gmra.mxu0 %vm467_vm2, %v458_v15  ;;  %799 = vmatmul.mubr.msk.bf16.vlgmr.msra.gmra.mxu1 %vm467_vm2, %v459_v16 }
 0x177   : > { %535 = vmatprep.mubr.bf16.mxu1 %v839_v1 }
 0x17e   : > { %800 = vmatmul.mubr.msk.bf16.gmra.mxu1 %vm467_vm2, %v460_v19 }
 0x17f   : > { %545 = vmatprep.mubr.bf16.mxu1 %v839_v1 }
 0x186   : > { %801 = vmatmul.mubr.msk.bf16.gmra.mxu1 %vm467_vm2, %v461_v22 }
 0x187   : > { %555 = vmatprep.mubr.bf16.mxu1 %v839_v1 }
 0x18e   : > { %802 = vmatmul.mubr.msk.bf16.gmra.mxu1 %vm467_vm2, %v462_v24 }
 0x236   : > { %v517_v25 = vpop.f32.mrf.mxu0  ;;  %v527_v26 = vpop.f32.mrf.mxu1 }
 0x237   : > { %597 = vrot.lane.b32.xlu0 %v517_v25, %s840_s12 }
 0x238   : > { %v519_v27 = vpop.f32.mrf.mxu0  ;;  %v529_v28 = vpop.f32.mrf.mxu1 }
 0x239   : > { %599 = vrot.lane.b32.xlu1 %v519_v27, %s840_s12 }
 0x23a   : > { %v531_v29 = vpop.f32.mrf.mxu1  ;;  %v521_v30 = vpop.f32.mrf.mxu0 }
 0x23b   : > { %629 = vrot.lane.b32.xlu0 %v527_v26, %s841_s13 }
 0x23c   : > { %v533_v31 = vpop.f32.mrf.mxu1  ;;  %v523_v32 = vpop.f32.mrf.mxu0 }
 0x23d   : > { %631 = vrot.lane.b32.xlu1 %v529_v28, %s841_s13 }
 0x23e   : > { %v991_v1 = vpop.f32.mrf.mxu1 }
 0x23f   : > { %616 = vrot.lane.b32.xlu0 %v521_v30, %s842_s14 }
 0x240   : > { %v993_v33 = vpop.f32.mrf.mxu1 }
 0x241   : > { %618 = vrot.lane.b32.xlu1 %v523_v32, %s842_s14 }
 0x242   : > { %v541_v34 = vpop.f32.mrf.mxu1 }
 0x243   : > { %648 = vrot.lane.b32.xlu0 %v531_v29, %s843_s15 }
 0x244   : > { %v543_v35 = vpop.f32.mrf.mxu1 }
 0x245   : > { %650 = vrot.lane.b32.xlu1 %v533_v31, %s843_s15 }
 0x246   : > { %v547_v36 = vpop.f32.mrf.mxu1 }
 0x247   : > { %665 = vrot.lane.b32.xlu0 %v541_v34, %s844_s16 }
 0x248   : > { %v549_v37 = vpop.f32.mrf.mxu1 }
 0x249   : > { %667 = vrot.lane.b32.xlu1 %v543_v35, %s844_s16 }
 0x24a   : > { %v551_v38 = vpop.f32.mrf.mxu1 }
 0x24b   : > { %680 = vrot.lane.b32.xlu0 %v547_v36, %s845_s17 }
 0x24c   : > { %v553_v39 = vpop.f32.mrf.mxu1 }
 0x24d   : > { %682 = vrot.lane.b32.xlu1 %v549_v37, %s845_s17 }
 0x24e   : > { %v557_v40 = vpop.f32.mrf.mxu1 }
 0x24f   : > { %695 = vrot.lane.b32.xlu0 %v551_v38, %s846_s18 }
 0x250   : > { %v559_v41 = vpop.f32.mrf.mxu1 }
 0x251   : > { %697 = vrot.lane.b32.xlu1 %v553_v39, %s846_s18 }
 0x252   : > { %v561_v42 = vpop.f32.mrf.mxu1 }
 0x253   : > { %708 = vrot.lane.b32.xlu0 %v557_v40, %s847_s19 }
 0x254   : > { %v562_v43 = vpop.f32.mrf.mxu1 }
 0x255   : > { %710 = vrot.lane.b32.xlu1 %v559_v41, %s847_s19 }
 0x2a9   : > { %v598_v46 = vpop.permute.xlu0 %597 }
 0x2aa   : > { %v605_v54 = vsel %vm601_vm3, 0.0, %v598_v46 }
 0x2ab   : > { %v600_v48 = vpop.permute.xlu1 %599  ;;  %v610_v60 = vsel %vm995_vm5, %v605_v54, 0.0 }
 0x2ac   : > { %v602_v56 = vsel %vm601_vm3, %v598_v46, %v600_v48 }
 0x2ad   : > { %v630_v51 = vpop.permute.xlu0 %629  ;;  %v611_v0 = vsel %vm999_vm6, %v602_v56, 0.0 }
 0x2ae   : > { %v637_v2 = vsel %vm633_vm7, 0.0, %v630_v51 }
 0x2af   : > { %v632_v52 = vpop.permute.xlu1 %631  ;;  %v642_v9 = vsel %vm1003_vm8, %v637_v2, 0.0 }
 0x2b0   : > { %v634_v62 = vsel %vm633_vm7, %v630_v51, %v632_v52 }
 0x2b1   : > { %v617_v57 = vpop.permute.xlu0 %616  ;;  %v643_v7 = vsel %vm1010_vm9, %v634_v62, 0.0 }
 0x2b2   : > { %v624_v59 = vsel %vm620_vm4, 0.0, %v617_v57 }
 0x2b3   : > { %v619_v63 = vpop.permute.xlu1 %618  ;;  %v625_v3 = vadd.f32 %v624_v59, %v610_v60 }
 0x2b4   : > { %v621_v4 = vsel %vm620_vm4, %v617_v57, %v619_v63 }
 0x2b5   : > { %v626_v5 = vadd.f32 %v621_v4, %v611_v0  ;;  %v649_v6 = vpop.permute.xlu0 %648  ;;  %v644_v12 = vadd.f32 %v642_v9, %v625_v3 }
 0x2b6   : > { %v656_v8 = vsel %vm652_vm10, 0.0, %v649_v6 }
 0x2b7   : > { %v645_v10 = vadd.f32 %v643_v7, %v626_v5  ;;  %v651_v11 = vpop.permute.xlu1 %650  ;;  %v657_v14 = vsel %vm995_vm5, %v656_v8, 0.0 }
 0x2b8   : > { %v653_v13 = vsel %vm652_vm10, %v649_v6, %v651_v11  ;;  %v659_v19 = vadd.f32 %v657_v14, %v644_v12 }
 0x2b9   : > { %v658_v15 = vsel %vm999_vm6, %v653_v13, 0.0  ;;  %v666_v16 = vpop.permute.xlu0 %665 }
 0x2ba   : > { %v660_v17 = vadd.f32 %v658_v15, %v645_v10  ;;  %v661_v27 = vadd.f32 %v659_v19, %v991_v1 }
 0x2bb   : > { %v668_v18 = vpop.permute.xlu1 %667 }
 0x2bc   : > { %v670_v20 = vsel %vm669_vm11, %v666_v16, %v668_v18  ;;  %v673_v21 = vsel %vm669_vm11, %v668_v18, 0.0  ;;  %v662_v23 = vadd.f32 %v660_v17, %v993_v33 }
 0x2bd   : > { %v681_v22 = vpop.permute.xlu0 %680  ;;  %v674_v24 = vsel %vm1003_vm8, %v670_v20, 0.0  ;;  %v675_v25 = vsel %vm1010_vm9, %v673_v21, 0.0 }
 0x2be   : > { %v676_v33 = vadd.f32 %v674_v24, %v661_v27  ;;  %v677_v34 = vadd.f32 %v675_v25, %v662_v23 }
 0x2bf   : > { %v683_v26 = vpop.permute.xlu1 %682 }
 0x2c0   : > { %v685_v28 = vsel %vm684_vm12, %v681_v22, %v683_v26  ;;  %v688_v29 = vsel %vm684_vm12, %v683_v26, 0.0 }
 0x2c1   : > { %v689_v30 = vsel %vm995_vm5, %v685_v28, 0.0  ;;  %v690_v31 = vsel %vm999_vm6, %v688_v29, 0.0  ;;  %v696_v32 = vpop.permute.xlu0 %695 }
 0x2c2   : > { %v691_v36 = vadd.f32 %v689_v30, %v676_v33  ;;  %v692_v37 = vadd.f32 %v690_v31, %v677_v34 }
 0x2c3   : > { %v698_v35 = vpop.permute.xlu1 %697 }
 0x2c4   : > { %v700_v38 = vsel %vm699_vm13, %v696_v32, %v698_v35  ;;  %v703_v39 = vsel %vm699_vm13, %v698_v35, 0.0 }
 0x2c5   : > { %v709_v1 = vpop.permute.xlu0 %708  ;;  %v704_v41 = vadd.f32 %v700_v38, %v691_v36  ;;  %v705_v42 = vadd.f32 %v703_v39, %v692_v37 }
 0x2c7   : > { %v711_v40 = vpop.permute.xlu1 %710 }
 0x2c8   : > { %v713_v43 = vsel %vm712_vm14, %v709_v1, %v711_v40  ;;  %v716_v44 = vsel %vm712_vm14, %v711_v40, 0.0 }
 0x2c9   : > { %v717_v45 = vsel %vm1003_vm8, %v713_v43, 0.0  ;;  %v718_v46 = vsel %vm1010_vm9, %v716_v44, 0.0 }
 0x2ca   : > { %v719_v47 = vadd.f32 %v717_v45, %v704_v41  ;;  %v720_v48 = vadd.f32 %v718_v46, %v705_v42 }
 0x2cc   : > { %803 = vst [vmem:[%s758_s22 + $0x10] sm:$0xff] %v719_v47  ;;  %804 = vst [vmem:[%s758_s22 + $0x18] sm:$0xff] %v720_v48 }
 0x2cd PF: > { %s17_s24 = sadd.s32 1, %s837_s24  }
 0x2ce   : > { %p14_p4 = scmp.ge.s32.totalorder %s17_s24, 4  }
 0x2d0   :  { %16 = sbr.rel (!%p14_p4) target bundleno = 1 (0x1), region = 78 }

// kernel: dense_block_forward.3
= control target key start
LH: loop header
LB: loop body
LE: loop exit
PB: predicated region body
PF: predicated region fallthrough
CT: control target
= control target key end

     0   :  { %s899_s24 = smov 0   ;;  %s1066_s0 = inlined_call_operand.vmem [shape: f32[2,24,256], index: 0, kind: input, shape index: {}, may-alias: {0,7}]   ;;  %s1067_s1 = inlined_call_operand.vmem [shape: f32[16,1], index: 1, kind: input, shape index: {}]   ;;  %s1068_s2 = inlined_call_operand.vmem [shape: f32[16,1], index: 2, kind: input, shape index: {}]   ;;  %s1069_s3 = inlined_call_operand.vmem [shape: f32[32,16], index: 3, kind: input, shape index: {}]   ;;  %s1070_s4 = inlined_call_operand.vmem [shape: f32[32,1], index: 4, kind: input, shape index: {}]   ;;  %s1071_s5 = inlined_call_operand.vmem [shape: f32[32,1], index: 5, kind: input, shape index: {}]   ;;  %s1072_s6 = inlined_call_operand.vmem [shape: f32[72,32], index: 6, kind: input, shape index: {}]   ;;  %s1073_s7 = inlined_call_operand.vmem [shape: f32[2,24,256], index: 7, kind: output, shape index: {}, may-alias: {0,7}]  }
   0x1 LB: > { %s800_s25 = sadd.s32 4294967295, %s848_s24   ;;  %p804_p0 = scmp.ge.s32.totalorder %s848_s24, 1  ;;  %s848_s24 = sphi %s899_s24, %s17_s24  }
   0x2   : > { %p237_p1 = scmp.lt.s32.totalorder %s848_s24, 3 }
   0x4   : > { %p238_p2 = pnand %p804_p0, %p237_p1 }
   0x5   : > { %p270_p3 = scmp.lt.s32.totalorder (!%p238_p2), %s800_s25, 1  ;;  %s851_s16 = smov (!%p238_p2), 17  }
   0x6   : > { %241 = sbr.rel (%p238_p2) target bundleno = 719 (0x2cf), region = 48  ;;  %s852_s17 = smov (!%p238_p2), 15  }
   0x7   : > { %s853_s18 = smov (!%p238_p2), 16   ;;  %s854_s19 = smov (!%p238_p2), 1  }
   0x8   : > { %s855_s20 = smov (!%p238_p2), 127   ;;  %s856_s21 = smov (!%p238_p2), 113  }
   0x9   : > { %s857_s22 = smov (!%p238_p2), 112   ;;  %s858_s23 = smov (!%p238_p2), 111  }
   0xb   : > { %v302_v0 = vld [vmem:[%s1068_s2] sm:$0xff]  ;;  %v850_v2 = vmov 0   ;;  %v303_v3 = vld [vmem:[%s1068_s2 + $0x8] sm:$0xff]  ;;  %v393_v5 = vld [vmem:[%s1070_s4 + $0x18] sm:$0xff]  ;;  %s1083_s25 = smov (!%p270_p3, %s800_s25), 1  ;;  %vm330_vm0 = vcmask 130048  }
   0xc   : > { %v286_v1 = vld [vmem:[%s1067_s1] sm:$0xff]  ;;  %841 = vset.pattern.permute.xlu1 %v850_v2  ;;  %840 = vset.pattern.permute.xlu0 %v850_v2  ;;  %v287_v4 = vld [vmem:[%s1067_s1 + $0x8] sm:$0xff]  ;;  %v392_v6 = vld [vmem:[%s1070_s4 + $0x10] sm:$0xff]  ;;  %s822_s29 = smul.u32 48, %s1083_s25  ;;  %vm480_vm1 = vcmask 261120   ;;  %vm614_vm2 = vcmask 138240  }
   0xd   : > { %306 = vperm.xlu1 %841, %v302_v0   ;;  %290 = vperm.xlu0 %840, %v286_v1   ;;  %v425_v7 = vld [vmem:[%s1071_s5 + $0x18] sm:$0xff]  ;;  %v424_v8 = vld [vmem:[%s1071_s5 + $0x10] sm:$0xff]  ;;  %v391_v9 = vld [vmem:[%s1070_s4 + $0x8] sm:$0xff]  ;;  %vm645_vm5 = vcmask 121856   ;;  %vm664_vm8 = vcmask 7168   ;;  %vm681_vm9 = vcmask 1039360  }
   0xe   : > { %369 = vmatprep.mubr.bf16.mxu0 %v850_v2  ;;  %538 = vmatprep.mubr.bf16.mxu1 %v850_v2  ;;  %v390_v10 = vld [vmem:[%s1070_s4] sm:$0xff]  ;;  %v423_v11 = vld [vmem:[%s1071_s5 + $0x8] sm:$0xff]  ;;  %s274_s9 = scalar_lea.vmem %s1066_s0, %s822_s29  ;;  %v324_v38 = vld [vmem:[%s1069_s3 + $0x10] sm:$0xff]  ;;  %vm696_vm10 = vcmask 924672   ;;  %vm711_vm11 = vcmask 916480   ;;  %vm724_vm12 = vcmask 908288   ;;  %s770_s28 = scalar_lea.vmem %s1073_s7, %s822_s29 }
   0xf   : > { %v422_v12 = vld [vmem:[%s1071_s5] sm:$0xff]  ;;  %v283_v14 = vld [vmem:[%s274_s9 + $0x8] sm:$0xff]  ;;  %v284_v19 = vld [vmem:[%s274_s9 + $0x10] sm:$0xff] }
  0x10   : > { %v282_v13 = vld [vmem:[%s274_s9] sm:$0xff]  ;;  %v285_v20 = vld [vmem:[%s274_s9 + $0x18] sm:$0xff]  ;;  %v323_v34 = vld [vmem:[%s1069_s3 + $0x8] sm:$0xff] }
  0x11   : > { %311 = vperm.xlu1 %841, %v303_v3   ;;  %295 = vperm.xlu0 %840, %v287_v4   ;;  %v322_v33 = vld [vmem:[%s1069_s3] sm:$0xff]  ;;  %v325_v39 = vld [vmem:[%s1069_s3 + $0x18] sm:$0xff] }
  0x12   : > { %v326_v37 = vpack.c.bf16 %v323_v34, %v322_v33  ;;  %v327_v40 = vpack.c.bf16 %v325_v39, %v324_v38  ;;  %v470_v34 = vld [vmem:[%s1072_s6 + $0x40] sm:$0xff] }
  0x15   : > { %411 = vperm.xlu1 %841, %v393_v5   ;;  %406 = vperm.xlu0 %840, %v392_v6  }
  0x19   : > { %443 = vperm.xlu1 %841, %v425_v7   ;;  %438 = vperm.xlu0 %840, %v424_v8  }
  0x1d   : > { %401 = vperm.xlu1 %841, %v391_v9   ;;  %396 = vperm.xlu0 %840, %v390_v10  }
  0x21   : > { %433 = vperm.xlu1 %841, %v423_v11   ;;  %428 = vperm.xlu0 %840, %v422_v12  }
  0x88   : > { %v307_v15 = vpop.permute.xlu1 %306  ;;  %v291_v16 = vpop.permute.xlu0 %290 }
  0x89   : > { %v298_v17 = vmul.f32 %v291_v16, %v282_v13  ;;  %v299_v18 = vmul.f32 %v291_v16, %v283_v14 }
  0x8b   : > { %v314_v22 = vadd.f32 %v307_v15, %v298_v17  ;;  %v315_v25 = vadd.f32 %v307_v15, %v299_v18 }
  0x8c   : > { %v296_v21 = vpop.permute.xlu0 %295  ;;  %v312_v26 = vpop.permute.xlu1 %311 }
  0x8d   : > { %v300_v23 = vmul.f32 %v296_v21, %v284_v19  ;;  %v301_v24 = vmul.f32 %v296_v21, %v285_v20  ;;  %v319_v29 = vmax.f32 %v315_v25, 0.0  ;;  %v318_v31 = vmax.f32 %v314_v22, 0.0  ;;  %v462_v20 = vld [vmem:[%s1072_s6] sm:$0xff]  ;;  %v463_v22 = vld [vmem:[%s1072_s6 + $0x8] sm:$0xff] }
  0x8f   : > { %v316_v27 = vadd.f32 %v312_v26, %v300_v23  ;;  %v317_v28 = vadd.f32 %v312_v26, %v301_v24  ;;  %v464_v23 = vld [vmem:[%s1072_s6 + $0x10] sm:$0xff]  ;;  %v465_v24 = vld [vmem:[%s1072_s6 + $0x18] sm:$0xff]  ;;  %v471_v26 = vpack.c.bf16 %v463_v22, %v462_v20 }
  0x90   : > { %v412_v41 = vpop.permute.xlu1 %411  ;;  %v407_v42 = vpop.permute.xlu0 %406 }
  0x91   : > { %v321_v30 = vmax.f32 %v317_v28, 0.0  ;;  %v320_v32 = vmax.f32 %v316_v27, 0.0  ;;  %v472_v27 = vpack.c.bf16 %v465_v24, %v464_v23  ;;  %v466_v28 = vld [vmem:[%s1072_s6 + $0x20] sm:$0xff] }
  0x93   : > { %v329_v35 = vpack.c.bf16 %v321_v30, %v319_v29  ;;  %v328_v36 = vpack.c.bf16 %v320_v32, %v318_v31  ;;  %v467_v29 = vld [vmem:[%s1072_s6 + $0x28] sm:$0xff]  ;;  %v468_v31 = vld [vmem:[%s1072_s6 + $0x30] sm:$0xff]  ;;  %v469_v32 = vld [vmem:[%s1072_s6 + $0x38] sm:$0xff] }
  0x94   : > { %v444_v44 = vpop.permute.xlu1 %443  ;;  %v439_v46 = vpop.permute.xlu0 %438  ;;  %v473_v30 = vpack.c.bf16 %v467_v29, %v466_v28  ;;  %v474_v33 = vpack.c.bf16 %v469_v32, %v468_v31 }
  0x95   : > { %351 = vmatprep.subr.bf16.mxu0 %v329_v35  ;;  %v475_v35 = vpack.c.bf16 %v470_v34, %v470_v34 }
  0x96   : > { %352 = vmatpush1.bf16.msra.mxu0 %v328_v36 }
  0x98   : > { %v402_v49 = vpop.permute.xlu1 %401  ;;  %v397_v51 = vpop.permute.xlu0 %396 }
  0x99   : > { %807 = vmatmul.mubr.msk.bf16.vlgmr.msra.gmra.mxu0 %vm330_vm0, %v326_v37 }
  0x9a   : > { %379 = vmatprep.mubr.bf16.mxu0 %v850_v2 }
  0x9c   : > { %v434_v59 = vpop.permute.xlu1 %433  ;;  %v429_v3 = vpop.permute.xlu0 %428 }
  0xa1   : > { %808 = vmatmul.mubr.msk.bf16.gmra.mxu0 %vm330_vm0, %v327_v40 }
  0xa2   : > { %528 = vmatprep.mubr.bf16.mxu0 %v850_v2 }
 0x159   : > { %v371_v43 = vpop.f32.mrf.mxu0 }
 0x15a   : > { %v414_v4 = vmul.f32 %v397_v51, %v371_v43 }
 0x15b   : > { %v373_v45 = vpop.f32.mrf.mxu0 }
 0x15c   : > { %v415_v57 = vmul.f32 %v397_v51, %v373_v45  ;;  %v446_v13 = vadd.f32 %v429_v3, %v414_v4 }
 0x15d   : > { %v375_v47 = vpop.f32.mrf.mxu0 }
 0x15e   : > { %v416_v60 = vmul.f32 %v402_v49, %v375_v47  ;;  %v447_v6 = vadd.f32 %v429_v3, %v415_v57  ;;  %v454_v21 = vmax.f32 %v446_v13, 0.0 }
 0x15f   : > { %v377_v48 = vpop.f32.mrf.mxu0 }
 0x160   : > { %v417_v53 = vmul.f32 %v402_v49, %v377_v48  ;;  %v448_v8 = vadd.f32 %v434_v59, %v416_v60  ;;  %v455_v15 = vmax.f32 %v447_v6, 0.0 }
 0x161   : > { %v381_v50 = vpop.f32.mrf.mxu0 }
 0x162   : > { %v418_v55 = vmul.f32 %v407_v42, %v381_v50  ;;  %v449_v62 = vadd.f32 %v434_v59, %v417_v53  ;;  %v456_v17 = vmax.f32 %v448_v8, 0.0 }
 0x163   : > { %v383_v52 = vpop.f32.mrf.mxu0 }
 0x164   : > { %v419_v54 = vmul.f32 %v407_v42, %v383_v52  ;;  %v450_v5 = vadd.f32 %v439_v46, %v418_v55  ;;  %v457_v10 = vmax.f32 %v449_v62, 0.0  ;;  %v476_v25 = vpack.c.bf16 %v456_v17, %v454_v21 }
 0x165   : > { %v385_v56 = vpop.f32.mrf.mxu0  ;;  %v577_v55 = vlaneseq }
 0x166   : > { %v420_v58 = vmul.f32 %v412_v41, %v385_v56  ;;  %v451_v63 = vadd.f32 %v439_v46, %v419_v54  ;;  %v458_v14 = vmax.f32 %v450_v5, 0.0  ;;  %v477_v19 = vpack.c.bf16 %v457_v10, %v455_v15 }
 0x167   : > { %v387_v61 = vpop.f32.mrf.mxu0  ;;  %v578_v56 = vand.u32 127, %v577_v55 }
 0x168   : > { %v452_v0 = vadd.f32 %v444_v44, %v420_v58  ;;  %v421_v1 = vmul.f32 %v412_v41, %v387_v61  ;;  %v459_v11 = vmax.f32 %v451_v63, 0.0 }
 0x169   : > { %v579_v58 = vadd.s32 128, %v578_v56  ;;  %v584_v60 = vand.u32 15, %v578_v56 }
 0x16a   : > { %v453_v7 = vadd.f32 %v444_v44, %v421_v1  ;;  %v460_v9 = vmax.f32 %v452_v0, 0.0 }
 0x16b   : > { %v591_v61 = vand.u32 15, %v579_v58  ;;  %vm1014_vm3 = vcmp.ge.s32.totalorder %v584_v60, 1  ;;  %vm1022_vm6 = vcmp.le.s32.totalorder %v584_v60, 14 }
 0x16c   : > { %v461_v12 = vmax.f32 %v453_v7, 0.0  ;;  %v478_v18 = vpack.c.bf16 %v460_v9, %v458_v14 }
 0x16d   : > { %vm1018_vm4 = vcmp.ge.s32.totalorder %v591_v61, 1  ;;  %vm1029_vm7 = vcmp.le.s32.totalorder %v591_v61, 14 }
 0x16e   : > { %v479_v16 = vpack.c.bf16 %v461_v12, %v459_v11 }
 0x170   : > { %508 = vmatprep.subr.bf16.mxu0 %v479_v16  ;;  %818 = vmatprep.subr.bf16.mxu1 %v479_v16 }
 0x171   : > { %509 = vmatpush1.bf16.msra.mxu0 %v478_v18  ;;  %820 = vmatpush1.bf16.msra.mxu1 %v478_v18 }
 0x172   : > { %510 = vmatprep.subr.bf16.mxu0 %v477_v19  ;;  %819 = vmatprep.subr.bf16.mxu1 %v477_v19 }
 0x175   : > { %511 = vmatpush1.bf16.msra.mxu0 %v476_v25  ;;  %821 = vmatpush1.bf16.msra.mxu1 %v476_v25 }
 0x178   : > { %809 = vmatmul.mubr.msk.bf16.vlgmr.msra.gmra.mxu0 %vm480_vm1, %v471_v26  ;;  %810 = vmatmul.mubr.msk.bf16.vlgmr.msra.gmra.mxu1 %vm480_vm1, %v472_v27 }
 0x179   : > { %548 = vmatprep.mubr.bf16.mxu1 %v850_v2 }
 0x180   : > { %811 = vmatmul.mubr.msk.bf16.gmra.mxu1 %vm480_vm1, %v473_v30 }
 0x181   : > { %558 = vmatprep.mubr.bf16.mxu1 %v850_v2 }
 0x188   : > { %812 = vmatmul.mubr.msk.bf16.gmra.mxu1 %vm480_vm1, %v474_v33 }
 0x189   : > { %568 = vmatprep.mubr.bf16.mxu1 %v850_v2 }
 0x190   : > { %813 = vmatmul.mubr.msk.bf16.gmra.mxu1 %vm480_vm1, %v475_v35 }
 0x238   : > { %v530_v36 = vpop.f32.mrf.mxu0  ;;  %v540_v37 = vpop.f32.mrf.mxu1 }
 0x239   : > { %610 = vrot.lane.b32.xlu0 %v530_v36, %s851_s16 }
 0x23a   : > { %v532_v38 = vpop.f32.mrf.mxu0  ;;  %v542_v39 = vpop.f32.mrf.mxu1 }
 0x23b   : > { %612 = vrot.lane.b32.xlu1 %v532_v38, %s851_s16 }
 0x23c   : > { %v544_v40 = vpop.f32.mrf.mxu1  ;;  %v534_v41 = vpop.f32.mrf.mxu0 }
 0x23d   : > { %641 = vrot.lane.b32.xlu0 %v540_v37, %s852_s17 }
 0x23e   : > { %v546_v42 = vpop.f32.mrf.mxu1  ;;  %v536_v43 = vpop.f32.mrf.mxu0 }
 0x23f   : > { %643 = vrot.lane.b32.xlu1 %v542_v39, %s852_s17 }
 0x240   : > { %v1010_v2 = vpop.f32.mrf.mxu1 }
 0x241   : > { %629 = vrot.lane.b32.xlu0 %v534_v41, %s853_s18 }
 0x242   : > { %v1012_v44 = vpop.f32.mrf.mxu1 }
 0x243   : > { %631 = vrot.lane.b32.xlu1 %v536_v43, %s853_s18 }
 0x244   : > { %v554_v45 = vpop.f32.mrf.mxu1 }
 0x245   : > { %660 = vrot.lane.b32.xlu0 %v544_v40, %s854_s19 }
 0x246   : > { %v556_v46 = vpop.f32.mrf.mxu1 }
 0x247   : > { %662 = vrot.lane.b32.xlu1 %v546_v42, %s854_s19 }
 0x248   : > { %v560_v47 = vpop.f32.mrf.mxu1 }
 0x249   : > { %677 = vrot.lane.b32.xlu0 %v554_v45, %s855_s20 }
 0x24a   : > { %v562_v48 = vpop.f32.mrf.mxu1 }
 0x24b   : > { %679 = vrot.lane.b32.xlu1 %v556_v46, %s855_s20 }
 0x24c   : > { %v564_v49 = vpop.f32.mrf.mxu1 }
 0x24d   : > { %692 = vrot.lane.b32.xlu0 %v560_v47, %s856_s21 }
 0x24e   : > { %v566_v50 = vpop.f32.mrf.mxu1 }
 0x24f   : > { %694 = vrot.lane.b32.xlu1 %v562_v48, %s856_s21 }
 0x250   : > { %v570_v51 = vpop.f32.mrf.mxu1 }
 0x251   : > { %707 = vrot.lane.b32.xlu0 %v564_v49, %s857_s22 }
 0x252   : > { %v572_v52 = vpop.f32.mrf.mxu1 }
 0x253   : > { %709 = vrot.lane.b32.xlu1 %v566_v50, %s857_s22 }
 0x254   : > { %v574_v53 = vpop.f32.mrf.mxu1 }
 0x255   : > { %720 = vrot.lane.b32.xlu0 %v570_v51, %s858_s23 }
 0x256   : > { %v575_v54 = vpop.f32.mrf.mxu1 }
 0x257   : > { %722 = vrot.lane.b32.xlu1 %v572_v52, %s858_s23 }
 0x2ab   : > { %v611_v57 = vpop.permute.xlu0 %610 }
 0x2ac   : > { %v618_v1 = vsel %vm614_vm2, 0.0, %v611_v57 }
 0x2ad   : > { %v613_v59 = vpop.permute.xlu1 %612  ;;  %v623_v8 = vsel %vm1014_vm3, %v618_v1, 0.0 }
 0x2ae   : > { %v615_v4 = vsel %vm614_vm2, %v611_v57, %v613_v59 }
 0x2af   : > { %v642_v62 = vpop.permute.xlu0 %641  ;;  %v624_v12 = vsel %vm1018_vm4, %v615_v4, 0.0 }
 0x2b0   : > { %v649_v13 = vsel %vm645_vm5, 0.0, %v642_v62 }
 0x2b1   : > { %v644_v63 = vpop.permute.xlu1 %643  ;;  %v654_v20 = vsel %vm1022_vm6, %v649_v13, 0.0 }
 0x2b2   : > { %v646_v10 = vsel %vm645_vm5, %v642_v62, %v644_v63 }
 0x2b3   : > { %v630_v5 = vpop.permute.xlu0 %629  ;;  %v655_v18 = vsel %vm1029_vm7, %v646_v10, 0.0 }
 0x2b4   : > { %v636_v7 = vsel %vm330_vm0, 0.0, %v630_v5 }
 0x2b5   : > { %v632_v11 = vpop.permute.xlu1 %631  ;;  %v637_v14 = vadd.f32 %v636_v7, %v623_v8 }
 0x2b6   : > { %v633_v15 = vsel %vm330_vm0, %v630_v5, %v632_v11 }
 0x2b7   : > { %v638_v16 = vadd.f32 %v633_v15, %v624_v12  ;;  %v661_v17 = vpop.permute.xlu0 %660  ;;  %v656_v23 = vadd.f32 %v654_v20, %v637_v14 }
 0x2b8   : > { %v668_v19 = vsel %vm664_vm8, 0.0, %v661_v17 }
 0x2b9   : > { %v657_v21 = vadd.f32 %v655_v18, %v638_v16  ;;  %v663_v22 = vpop.permute.xlu1 %662  ;;  %v669_v25 = vsel %vm1014_vm3, %v668_v19, 0.0 }
 0x2ba   : > { %v665_v24 = vsel %vm664_vm8, %v661_v17, %v663_v22  ;;  %v671_v30 = vadd.f32 %v669_v25, %v656_v23 }
 0x2bb   : > { %v670_v26 = vsel %vm1018_vm4, %v665_v24, 0.0  ;;  %v678_v27 = vpop.permute.xlu0 %677 }
 0x2bc   : > { %v672_v28 = vadd.f32 %v670_v26, %v657_v21  ;;  %v673_v38 = vadd.f32 %v671_v30, %v1010_v2 }
 0x2bd   : > { %v680_v29 = vpop.permute.xlu1 %679 }
 0x2be   : > { %v682_v31 = vsel %vm681_vm9, %v678_v27, %v680_v29  ;;  %v685_v32 = vsel %vm681_vm9, %v680_v29, 0.0  ;;  %v674_v34 = vadd.f32 %v672_v28, %v1012_v44 }
 0x2bf   : > { %v693_v33 = vpop.permute.xlu0 %692  ;;  %v686_v35 = vsel %vm1022_vm6, %v682_v31, 0.0  ;;  %v687_v36 = vsel %vm1029_vm7, %v685_v32, 0.0 }
 0x2c0   : > { %v688_v44 = vadd.f32 %v686_v35, %v673_v38  ;;  %v689_v45 = vadd.f32 %v687_v36, %v674_v34 }
 0x2c1   : > { %v695_v37 = vpop.permute.xlu1 %694 }
 0x2c2   : > { %v697_v39 = vsel %vm696_vm10, %v693_v33, %v695_v37  ;;  %v700_v40 = vsel %vm696_vm10, %v695_v37, 0.0 }
 0x2c3   : > { %v701_v41 = vsel %vm1014_vm3, %v697_v39, 0.0  ;;  %v702_v42 = vsel %vm1018_vm4, %v700_v40, 0.0  ;;  %v708_v43 = vpop.permute.xlu0 %707 }
 0x2c4   : > { %v703_v47 = vadd.f32 %v701_v41, %v688_v44  ;;  %v704_v48 = vadd.f32 %v702_v42, %v689_v45 }
 0x2c5   : > { %v710_v46 = vpop.permute.xlu1 %709 }
 0x2c6   : > { %v712_v49 = vsel %vm711_vm11, %v708_v43, %v710_v46  ;;  %v715_v50 = vsel %vm711_vm11, %v710_v46, 0.0 }
 0x2c7   : > { %v721_v2 = vpop.permute.xlu0 %720  ;;  %v716_v52 = vadd.f32 %v712_v49, %v703_v47  ;;  %v717_v53 = vadd.f32 %v715_v50, %v704_v48 }
 0x2c9   : > { %v723_v51 = vpop.permute.xlu1 %722 }
 0x2ca   : > { %v725_v54 = vsel %vm724_vm12, %v721_v2, %v723_v51  ;;  %v728_v55 = vsel %vm724_vm12, %v723_v51, 0.0 }
 0x2cb   : > { %v729_v56 = vsel %vm1022_vm6, %v725_v54, 0.0  ;;  %v730_v57 = vsel %vm1029_vm7, %v728_v55, 0.0 }
 0x2cc   : > { %v731_v58 = vadd.f32 %v729_v56, %v716_v52  ;;  %v732_v59 = vadd.f32 %v730_v57, %v717_v53 }
 0x2ce   : > { %814 = vst [vmem:[%s770_s28 + $0x20] sm:$0xff] %v731_v58  ;;  %815 = vst [vmem:[%s770_s28 + $0x28] sm:$0xff] %v732_v59 }
 0x2cf PF: > { %s17_s24 = sadd.s32 1, %s848_s24  }
 0x2d0   : > { %p14_p4 = scmp.ge.s32.totalorder %s17_s24, 4  }
 0x2d2   :  { %16 = sbr.rel (!%p14_p4) target bundleno = 1 (0x1), region = 78 }

</bundles_post_ra>
